<compile_context>
chip_gen: v7x
topology: tpu7x:2x2x1
jax: 0.10.0
libtpu: 0.0.40
codegen_flags: <defaults>
</compile_context>

<pallas_src>
import functools

import jax
import jax.numpy as jnp
import numpy as np
from jax.experimental import pallas as pl
from jax.experimental.pallas import tpu as pltpu

# ----------------------------- configuration --------------------------------
BS, T1, T2 = 2, 4, 8          # batch, #segments per sample, segment length
INPUT_DIM = 4                 # args.input_dim
D_MODEL = 32                  # args.d_model
HIDDEN = 32                   # args.hidden_size
CONCEPT_DIM = 16              # args.concept_dim
N_LAYERS = 2                  # args.n_layers
KSIZE = 3                     # TCN conv kernel size

assert D_MODEL == HIDDEN, "embedding fold below assumes d_model == hidden_size"
assert 128 % CONCEPT_DIM == 0
PACK = 128 // CONCEPT_DIM     # logical rows packed into one 128-lane output row
LANES = PACK * CONCEPT_DIM    # = 128
BROW = 8                      # sublane-aligned row slot per constant in the bias block


def _round_up(x, m):
    return (x + m - 1) // m * m


def _schedule(T):
    """Per-layer sets of OUTPUT timesteps (absolute, >= 0) needed to produce the
    final timestep of the last layer.  Negative times are dropped (they are the
    causal zero padding and contribute nothing)."""
    S = [None] * N_LAYERS
    S[N_LAYERS - 1] = [T - 1]
    for l in range(N_LAYERS - 2, -1, -1):
        dil_next = 2 ** (l + 1)
        times = {t - k * dil_next for t in S[l + 1] for k in range(KSIZE)}
        S[l] = sorted(t for t in times if t >= 0)
    return S


# --------------------------- weight compilation -------------------------------
def _pack_params(params, T, compute_dtype):
    """Build, at trace time:
      * one dense matmul weight per stage (TCN layers + head) over lane-dense
        time*channel blocks, with the DataEmbedding folded into layer 0,
      * per-stage biases (layer-0 bias includes b_emb only for taps that read
        real data, exactly matching causal zero padding of the embedded sequence),
      * the head weight tiled to 128 lanes + the (PACK, 128) row->lane pack mask,
    and consolidate them into two VMEM blocks (bf16 weights, f32 constants)."""
    w_emb, b_emb, w_tcn, b_tcn, w_out, b_out = params
    C, H = INPUT_DIM, HIDDEN
    S = _schedule(T)

    stages = []   # (k_dim, n_dim, weight f32, bias f32)

    # ---- layer 0: embedding folded in; operates on raw lane-dense x (T*C) ----
    n0 = len(S[0]) * H
    w0 = jnp.zeros((T * C, n0), jnp.float32)
    b0 = jnp.zeros((1, n0), jnp.float32)
    for j, t in enumerate(S[0]):
        btap = b_tcn[0].reshape(1, H)
        for k in range(KSIZE):
            ti = t - k                              # dilation 1
            if ti < 0:
                continue                            # causal zero padding
            fused = w_emb @ w_tcn[0, k]             # (C, H)
            w0 = w0.at[ti * C:(ti + 1) * C, j * H:(j + 1) * H].add(fused)
            btap = btap + b_emb.reshape(1, -1) @ w_tcn[0, k]
        b0 = b0.at[:, j * H:(j + 1) * H].set(btap)
    stages.append((T * C, n0, w0, b0))

    # ---- layers 1 .. N_LAYERS-1 ----
    for l in range(1, N_LAYERS):
        dil = 2 ** l
        kprev = len(S[l - 1]) * H
        nl = len(S[l]) * H
        wl = jnp.zeros((kprev, nl), jnp.float32)
        for j, t in enumerate(S[l]):
            for k in range(KSIZE):
                ti = t - k * dil
                if ti < 0 or ti not in S[l - 1]:
                    continue                        # reads causal zero padding
                i = S[l - 1].index(ti)
                wl = wl.at[i * H:(i + 1) * H, j * H:(j + 1) * H].add(w_tcn[l, k])
        bl = jnp.tile(b_tcn[l].reshape(1, H), (1, len(S[l])))
        stages.append((kprev, nl, wl, bl))

    # ---- head: tiled to 128 lanes so the packed store is full-lane ----
    kh = len(S[-1]) * H                             # == H (final layer keeps 1 step)
    wh = jnp.tile(w_out, (1, PACK))                 # (H, 128)
    bh = jnp.tile(b_out.reshape(1, CONCEPT_DIM), (1, PACK))
    stages.append((kh, LANES, wh, bh))

    # ---- consolidate into one bf16 weight block + one f32 constant block ----
    width = _round_up(max(nd for _, nd, _, _ in stages), 128)
    row_offs, rows = [], 0
    for kd, _, _, _ in stages:
        row_offs.append(rows)
        rows += _round_up(kd, 8)
    wblk = jnp.zeros((rows, width), jnp.float32)
    for (kd, nd, w, _), off in zip(stages, row_offs):
        wblk = wblk.at[off:off + kd, :nd].set(w)
    wblk = wblk.astype(compute_dtype)

    n_stages = len(stages)
    bblk = jnp.zeros((n_stages * BROW + _round_up(PACK, BROW), width), jnp.float32)
    for s, (_, nd, _, b) in enumerate(stages):
        bblk = bblk.at[s * BROW:s * BROW + 1, :nd].set(b)
    # pack-selection mask: lane group p of a packed row comes from logical row p
    mask_np = (np.arange(LANES)[None, :] // CONCEPT_DIM
               == np.arange(PACK)[:, None]).astype(np.float32)
    bblk = bblk.at[n_stages * BROW:n_stages * BROW + PACK, :LANES].set(
        jnp.asarray(mask_np))

    layout = tuple((off, kd, nd) for (kd, nd, _, _), off in zip(stages, row_offs))
    return wblk, bblk, layout


# ------------------------------ Pallas kernel ---------------------------------
def _encoder_kernel(x_ref, w_ref, b_ref, o_ref, *, layout, compute_dtype):
    n_stages = len(layout)
    h = x_ref[...].astype(compute_dtype)                       # (tile_n, T*C)
    acc = None
    for s, (off, kd, nd) in enumerate(layout):
        w = w_ref[off:off + kd, 0:nd]                          # static slice view
        b = b_ref[s * BROW:s * BROW + 1, 0:nd]                 # (1, nd) f32
        acc = jnp.dot(h, w, preferred_element_type=jnp.float32) + b
        if s + 1 < n_stages:                                   # hidden layers: ReLU
            h = jax.nn.relu(acc).astype(compute_dtype)

    # acc: (tile_n, 128) head output, every CONCEPT_DIM-wide lane group identical.
    # Pack PACK consecutive logical rows into one 128-lane row: lane group p of
    # packed row g <- logical row PACK*g + p (mask-select over the sublane axis).
    tile_n = acc.shape[0]
    mask = b_ref[n_stages * BROW:n_stages * BROW + PACK, 0:LANES]   # (PACK, 128)
    packed = jnp.sum(acc.reshape(tile_n // PACK, PACK, LANES) * mask[None, :, :],
                     axis=1)
    o_ref[...] = packed.astype(o_ref.dtype)                    # full-lane store


# ------------------------------ wrapper ----------------------------------------
def tcn_encode(flat_seq, params, *, compute_dtype=jnp.bfloat16, tile_n=None):
    """flat_seq: (N, T, INPUT_DIM) -> (N, CONCEPT_DIM) via one Pallas call."""
    N, T, C = flat_seq.shape
    assert C == INPUT_DIM

    wblk, bblk, layout = _pack_params(params, T, compute_dtype)

    if tile_n is None:
        # >= 2 grid steps for large N (v7x megacore + DMA/compute overlap), tiles a
        # multiple of 64 rows (keeps the packed (tile_n//8, 128) output block
        # (8,128)-aligned), capped at 4096 rows so double-buffered tiles plus f32
        # intermediates stay well inside v7x's 32 MiB / v5e's scoped VMEM.
        tile_n = max(64, min(4096, _round_up(pl.cdiv(N, 2), 64)))
    assert tile_n % 64 == 0 and tile_n % PACK == 0
    n_pad = _round_up(N, tile_n)

    # lane-dense input (N, T*C); free HBM reshape.  Cast to bf16 happens inside the
    # kernel, so callers can feed bf16 directly to halve input HBM traffic.
    x2d = flat_seq.reshape(N, T * C)
    if n_pad != N:
        x2d = jnp.pad(x2d, ((0, n_pad - N), (0, 0)))

    kernel = functools.partial(_encoder_kernel, layout=layout,
                               compute_dtype=compute_dtype)

    flops_row = sum(2 * kd * nd for _, kd, nd in layout)
    bytes_acc = int(x2d.size * x2d.dtype.itemsize
                    + wblk.size * wblk.dtype.itemsize
                    + bblk.size * bblk.dtype.itemsize
                    + (n_pad // PACK) * LANES * 4)

    out = pl.pallas_call(
        kernel,
        out_shape=jax.ShapeDtypeStruct((n_pad // PACK, LANES), jnp.float32),
        grid_spec=pl.GridSpec(
            grid=(n_pad // tile_n,),
            in_specs=[
                pl.BlockSpec((tile_n, T * C), lambda i: (i, 0)),
                pl.BlockSpec(wblk.shape, lambda i: (0, 0)),
                pl.BlockSpec(bblk.shape, lambda i: (0, 0)),
            ],
            out_specs=pl.BlockSpec((tile_n // PACK, LANES), lambda i: (i, 0)),
        ),
        compiler_params=pltpu.CompilerParams(
            dimension_semantics=("parallel",),
            vmem_limit_bytes=32 * 1024 * 1024),
        cost_estimate=pl.CostEstimate(flops=int(n_pad * flops_row),
                                      transcendentals=0,
                                      bytes_accessed=bytes_acc),
    )(x2d, wblk, bblk)

    # unpack: (n_pad//PACK, 128) -> (n_pad, CONCEPT_DIM) is a free row-major reshape
    return out.reshape(n_pad, CONCEPT_DIM)[:N]


# --------------------------- module-level glue --------------------------------
def sequence_trimmer(seq, times):
    # TODO(synk): SequenceTrimmer wraps an external, data-dependent refer-model;
    # here it is replaced by a deterministic split of the sequence into T1
    # non-overlapping windows of length T2 with an all-True mask.
    bs, L, c = seq.shape
    all_seq = seq.reshape(bs, T1, T2, c)
    mask = jnp.ones((bs, T1, T2), dtype=jnp.bool_)
    segment_info = times.reshape(bs, T1, T2)[:, :, 0]
    return segment_info, all_seq, mask


def heatmap_encoder_forward(seq, times, params, *, compute_dtype=jnp.bfloat16):
    """Mirrors HeatmapEncoder.forward (task_type='classify')."""
    segment_info, all_seq, mask = sequence_trimmer(seq, times)
    # TODO(synk): the all-True stub mask is never applied inside the kernel; real
    # variable-length segments would need their lengths fed in (scalar prefetch)
    # to pick the true last timestep.
    bs, t1, t2, c = all_seq.shape
    flat = all_seq.reshape(bs * t1, t2, c)
    out = tcn_encode(flat, params, compute_dtype=compute_dtype)   # (bs*t1, concept)
    outputs = out.reshape(bs, t1, CONCEPT_DIM)
    # TODO(synk): self.fc is only used in the forecast path in the PyTorch module,
    # so it is intentionally not applied here; dropout(p=0.0) is a no-op.
    return outputs, all_seq, mask, segment_info


# ------------------------------ parameters ------------------------------------
def init_params(key):
    """Kaiming-normal weights, zero biases (mirrors _init_weights)."""
    k_emb, k_tcn, k_out = jax.random.split(key, 3)

    def kaiming(k, shape, fan_in):
        return jax.random.normal(k, shape, jnp.float32) * jnp.sqrt(2.0 / fan_in)

    w_emb = kaiming(k_emb, (INPUT_DIM, D_MODEL), INPUT_DIM)
    b_emb = jnp.zeros((1, D_MODEL), jnp.float32)

    tcn_keys = jax.random.split(k_tcn, N_LAYERS * KSIZE)
    w_tcn = jnp.stack([
        jnp.stack([kaiming(tcn_keys[l * KSIZE + k], (HIDDEN, HIDDEN),
                           HIDDEN * KSIZE) for k in range(KSIZE)], axis=0)
        for l in range(N_LAYERS)], axis=0)               # (L, K, H, H), (in, out)
    b_tcn = jnp.zeros((N_LAYERS, 1, HIDDEN), jnp.float32)

    w_out = kaiming(k_out, (HIDDEN, CONCEPT_DIM), HIDDEN)
    b_out = jnp.zeros((1, CONCEPT_DIM), jnp.float32)
    return (w_emb, b_emb, w_tcn, b_tcn, w_out, b_out)


# ------------------------------ pure-JAX reference ----------------------------
def _reference(flat_seq, params):
    """Full-sequence causal dilated conv reference (embedding NOT folded)."""
    w_emb, b_emb, w_tcn, b_tcn, w_out, b_out = params
    hp = jax.lax.Precision.HIGHEST
    h = jnp.einsum('ntc,cd->ntd', flat_seq, w_emb, precision=hp) + b_emb[None]
    T = h.shape[1]
    for l in range(N_LAYERS):
        dil = 2 ** l
        acc = jnp.zeros((h.shape[0], T, HIDDEN), jnp.float32)
        for k in range(KSIZE):
            s = k * dil
            shifted = h if s == 0 else jnp.pad(h[:, :T - s, :],
                                               ((0, 0), (s, 0), (0, 0)))
            acc = acc + jnp.einsum('ntc,cd->ntd', shifted, w_tcn[l, k],
                                   precision=hp)
        h = jax.nn.relu(acc + b_tcn[l][None])
    return jnp.dot(h[:, -1, :], w_out, precision=hp) + b_out


# ----------------------------------- main --------------------------------------
if __name__ == "__main__":
    key = jax.random.PRNGKey(0)
    k_seq, k_t, k_p, k_b = jax.random.split(key, 4)

    seq = jax.random.normal(k_seq, (BS, T1 * T2, INPUT_DIM), jnp.float32)
    times = jnp.arange(BS * T1 * T2, dtype=jnp.float32).reshape(BS, T1 * T2)

    params = init_params(k_p)
    # Use non-zero biases for testing so the bias / causal-padding handling is
    # actually exercised (the PyTorch init zeroes them, which would hide bugs).
    kb1, kb2, kb3 = jax.random.split(k_b, 3)
    params = (params[0],
              0.1 * jax.random.normal(kb1, params[1].shape, jnp.float32),
              params[2],
              0.1 * jax.random.normal(kb2, params[3].shape, jnp.float32),
              params[4],
              0.1 * jax.random.normal(kb3, params[5].shape, jnp.float32))

    flat = seq.reshape(BS * T1, T2, INPUT_DIM)

    # f32 path: strict structural check (folded weights, packed output) vs reference
    out_f32 = jax.block_until_ready(
        tcn_encode(flat, params, compute_dtype=jnp.float32))
    ref = _reference(flat, params)
    np.testing.assert_allclose(np.asarray(out_f32), np.asarray(ref),
                               rtol=1e-3, atol=1e-3)

    # short-segment check (T2=4 < receptive field 7): exercises causal padding
    flat_small = flat[:, :4, :]
    out_small = jax.block_until_ready(
        tcn_encode(flat_small, params, compute_dtype=jnp.float32))
    ref_small = _reference(flat_small, params)
    np.testing.assert_allclose(np.asarray(out_small), np.asarray(ref_small),
                               rtol=1e-3, atol=1e-3)

    # default bf16 path through the module-level forward
    out_bf16, all_seq, mask, segment_info = heatmap_encoder_forward(
        seq, times, params)
    out_bf16 = jax.block_until_ready(out_bf16)
    np.testing.assert_allclose(np.asarray(out_bf16).reshape(BS * T1, CONCEPT_DIM),
                               np.asarray(ref), rtol=5e-2, atol=1.5e-1)

    assert out_bf16.shape == (BS, T1, CONCEPT_DIM)
    print("KERNEL_OK")
</pallas_src>

<mosaic_0001>
module attributes {stable_mosaic.version = 11 : i64} {
  func.func @_encoder_kernel(%arg0: i32, %arg1: memref<64x32xf32, #tpu.memory_space<vmem>>, %arg2: memref<160x128xf32, #tpu.memory_space<vmem>>, %arg3: memref<32x128xf32, #tpu.memory_space<vmem>>, %arg4: memref<8x128xf32, #tpu.memory_space<vmem>>) attributes {dimension_semantics = [#tpu.dimension_semantics<parallel>], iteration_bounds = array<i64: 1>, scalar_prefetch = 0 : i64, scratch_operands = 0 : i64, tpu.core_type = #tpu.core_type<tc>, window_params = [{transform_indices = @transform_0, window_bounds = array<i64: 64, 32>}, {pipeline_mode = #tpu.pipeline_mode<synchronous>, transform_indices = @transform_1, window_bounds = array<i64: 160, 128>}, {pipeline_mode = #tpu.pipeline_mode<synchronous>, transform_indices = @transform_2, window_bounds = array<i64: 32, 128>}, {transform_indices = @transform_3, window_bounds = array<i64: 8, 128>}]} {
    %c0 = arith.constant 0 : index
    %c0_0 = arith.constant 0 : index
    %0 = vector.load %arg1[%c0, %c0_0] : memref<64x32xf32, #tpu.memory_space<vmem>>, vector<64x32xf32>
    %c0_1 = arith.constant 0 : index
    %c0_2 = arith.constant 0 : index
    %1 = vector.load %arg2[%c0_1, %c0_2] : memref<160x128xf32, #tpu.memory_space<vmem>>, vector<32x96xf32>
    %c0_3 = arith.constant 0 : index
    %c0_4 = arith.constant 0 : index
    %2 = vector.load %arg3[%c0_3, %c0_4] : memref<32x128xf32, #tpu.memory_space<vmem>>, vector<1x96xf32>
    %cst = arith.constant dense<0.000000e+00> : vector<64x96xf32>
    %3 = tpu.matmul %0, %1, %cst {dimension_numbers = #tpu.dot_dimension_numbers<[1], [0], [0], [1], [0, 0, 1, 1], [], []>} : vector<64x32xf32>, vector<32x96xf32>, vector<64x96xf32> -> vector<64x96xf32>
    %4 = vector.broadcast %2 : vector<1x96xf32> to vector<64x96xf32>
    %5 = arith.addf %3, %4 : vector<64x96xf32>
    %cst_5 = arith.constant 0.000000e+00 : f32
    %6 = vector.broadcast %cst_5 : f32 to vector<64x96xf32>
    %7 = arith.maximumf %5, %6 : vector<64x96xf32>
    %c32 = arith.constant 32 : index
    %c0_6 = arith.constant 0 : index
    %8 = vector.load %arg2[%c32, %c0_6] : memref<160x128xf32, #tpu.memory_space<vmem>>, vector<96x32xf32>
    %c8 = arith.constant 8 : index
    %c0_7 = arith.constant 0 : index
    %9 = vector.load %arg3[%c8, %c0_7] : memref<32x128xf32, #tpu.memory_space<vmem>>, vector<1x32xf32>
    %cst_8 = arith.constant dense<0.000000e+00> : vector<64x32xf32>
    %10 = tpu.matmul %7, %8, %cst_8 {dimension_numbers = #tpu.dot_dimension_numbers<[1], [0], [0], [1], [0, 0, 1, 1], [], []>} : vector<64x96xf32>, vector<96x32xf32>, vector<64x32xf32> -> vector<64x32xf32>
    %11 = vector.broadcast %9 : vector<1x32xf32> to vector<64x32xf32>
    %12 = arith.addf %10, %11 : vector<64x32xf32>
    %cst_9 = arith.constant 0.000000e+00 : f32
    %13 = vector.broadcast %cst_9 : f32 to vector<64x32xf32>
    %14 = arith.maximumf %12, %13 : vector<64x32xf32>
    %c128 = arith.constant 128 : index
    %c0_10 = arith.constant 0 : index
    %15 = vector.load %arg2[%c128, %c0_10] : memref<160x128xf32, #tpu.memory_space<vmem>>, vector<32x128xf32>
    %c16 = arith.constant 16 : index
    %c0_11 = arith.constant 0 : index
    %16 = vector.load %arg3[%c16, %c0_11] : memref<32x128xf32, #tpu.memory_space<vmem>>, vector<1x128xf32>
    %cst_12 = arith.constant dense<0.000000e+00> : vector<64x128xf32>
    %17 = tpu.matmul %14, %15, %cst_12 {dimension_numbers = #tpu.dot_dimension_numbers<[1], [0], [0], [1], [0, 0, 1, 1], [], []>} : vector<64x32xf32>, vector<32x128xf32>, vector<64x128xf32> -> vector<64x128xf32>
    %18 = vector.broadcast %16 : vector<1x128xf32> to vector<64x128xf32>
    %19 = arith.addf %17, %18 : vector<64x128xf32>
    %c24 = arith.constant 24 : index
    %c0_13 = arith.constant 0 : index
    %20 = vector.load %arg3[%c24, %c0_13] : memref<32x128xf32, #tpu.memory_space<vmem>>, vector<8x128xf32>
    %21 = vector.shape_cast %19 : vector<64x128xf32> to vector<8x8x128xf32>
    %22 = vector.shape_cast %20 : vector<8x128xf32> to vector<1x8x128xf32>
    %23 = vector.broadcast %22 : vector<1x8x128xf32> to vector<8x8x128xf32>
    %24 = arith.mulf %21, %23 : vector<8x8x128xf32>
    %cst_14 = arith.constant dense<0.000000e+00> : vector<8x128xf32>
    %25 = vector.multi_reduction <add>, %24, %cst_14 [1] : vector<8x8x128xf32> to vector<8x128xf32>
    %c0_15 = arith.constant 0 : index
    %c0_16 = arith.constant 0 : index
    %26 = vector.load %arg4[%c0_15, %c0_16] : memref<8x128xf32, #tpu.memory_space<vmem>>, vector<8x128xf32>
    tpu.vector_store %arg4[%c0_15, %c0_16], %25 {strides = array<i32>} : memref<8x128xf32, #tpu.memory_space<vmem>>, vector<8x128xf32>,
    return
  }
  func.func @transform_0(%arg0: i32) -> (i32, i32) {
    %c0_i32 = arith.constant 0 : i32
    %c0_i32_0 = arith.constant 0 : i32
    return %arg0, %c0_i32 : i32, i32
  }
  func.func @transform_1(%arg0: i32) -> (i32, i32) {
    %c0_i32 = arith.constant 0 : i32
    %c0_i32_0 = arith.constant 0 : i32
    %c0_i32_1 = arith.constant 0 : i32
    return %c0_i32, %c0_i32_0 : i32, i32
  }
  func.func @transform_2(%arg0: i32) -> (i32, i32) {
    %c0_i32 = arith.constant 0 : i32
    %c0_i32_0 = arith.constant 0 : i32
    %c0_i32_1 = arith.constant 0 : i32
    return %c0_i32, %c0_i32_0 : i32, i32
  }
  func.func @transform_3(%arg0: i32) -> (i32, i32) {
    %c0_i32 = arith.constant 0 : i32
    %c0_i32_0 = arith.constant 0 : i32
    return %arg0, %c0_i32 : i32, i32
  }
}

</mosaic_0001>

<bundles_post_ra>
// kernel: tpu_custom_call.1
= control target key start
LH: loop header
LB: loop body
LE: loop exit
PB: predicated region body
PF: predicated region fallthrough
CT: control target
= control target key end

     0   :  { %8 = vsyncpa [#allocation3], 0  ;;  %s921_s0 = inlined_call_operand.vmem [shape: f32[64,32], index: 0, kind: input, shape index: {}]   ;;  %s922_s1 = inlined_call_operand.hbm [shape: f32[160,128], index: 1, kind: input, shape index: {}]   ;;  %s923_s2 = inlined_call_operand.vmem [shape: f32[32,128], index: 2, kind: input, shape index: {}]   ;;  %s924_s3 = inlined_call_operand.hbm [shape: f32[8,128], index: 3, kind: output, shape index: {}]  }
   0x1   :  { %9 = vsyncpa [#allocation4], 0  ;;  %s812_s12 = smov [#allocation2]   ;;  %s764_s16 = scalar_lea.hbm %s922_s1, 2560 }
   0x2   :  { %s17_s13 = sshll.u32 %s812_s12, 4  ;;  %p765_p0 = scmp.ne.s32.totalorder %s922_s1, %s764_s16  ;;  %s18_s13 = int_to_ptr.vmem [resolvable:$true] %s17_s13 }
   0x3   :  { %p768_p1 = scmp.lt.u32.totalorder %s764_s16, %s922_s1 }
   0x5   :  { %p770_p2 = pnand %p768_p1, %p765_p0 }
   0x7   :  { %773 = shalt.err (!%p770_p2)
}
   0x8   :  { %s774_s21 = scalar_lea.vmem %s18_s13, 2560  ;;  %p779_p4 = scmp.lt.s32.totalorder %s18_s13, %s18_s13 }
   0x9   :  { %p775_p3 = scmp.ne.s32.totalorder %s18_s13, %s774_s21  ;;  %p780_p5 = scmp.lt.s32.totalorder %s774_s21, %s774_s21 }
   0xb   :  { %p781_p6 = por %p780_p5, %p779_p4 }
   0xd   :  { %p782_p7 = pnand %p781_p6, %p775_p3 }
   0xf   :  { %785 = shalt.err (!%p782_p7)
}
  0x10   :  { %s813_s22 = smov 128   ;;  %s814_s23 = smov 8  }
  0x11   :  { %23 = dma.hbm_to_vmem [thread:$0]  %s922_s1, 2560, %s18_s13, [#allocation3], %s813_s22, %s813_s22, %s814_s23  }
  0x12   :  { %808 = dma.done.wait [#allocation3], 2560  }
  0x13   :  { %809 = vsyncadd [#allocation3], 4294964736  ;;  %vm46_vm0 = vcmask 261120   ;;  %v37_v0 = vld [vmem:[#allocation2] sm:$0xff]  ;;  %v38_v1 = vld [vmem:[#allocation2 + $0x8] sm:$0xff]  ;;  %vm201_vm1 = vcmask 785408  }
  0x14   :  { %v39_v2 = vld [vmem:[#allocation2 + $0x10] sm:$0xff]  ;;  %v720_v3 = vpack.c.bf16 %v38_v1, %v37_v0  ;;  %v40_v4 = vld [vmem:[#allocation2 + $0x18] sm:$0xff]  ;;  %v29_v5 = vld [vmem:[%s921_s0] sm:$0xff]  ;;  %vm542_vm2 = vcmask 1041409   ;;  %vm544_vm3 = vcmask 1042434   ;;  %vm546_vm4 = vcmask 1043459  }
  0x15   :  { %v724_v6 = vpack.c.bf16 %v40_v4, %v39_v2  ;;  %652 = vmatprep.mubr.msk.f32.mxu0 %vm46_vm0, %v29_v5  ;;  %v184_v7 = vld [vmem:[#allocation2 + $0x20] sm:$0xff]  ;;  %v185_v8 = vld [vmem:[#allocation2 + $0x28] sm:$0xff]  ;;  %v186_v9 = vld [vmem:[#allocation2 + $0x30] sm:$0xff]  ;;  %vm548_vm5 = vcmask 1044484   ;;  %vm550_vm6 = vcmask 1045509   ;;  %vm552_vm7 = vcmask 1046534  }
  0x16   :  { %721 = vmatprep.subr.bf16.mxu0 %v720_v3  ;;  %v728_v10 = vpack.c.bf16 %v185_v8, %v184_v7  ;;  %v187_v11 = vld [vmem:[#allocation2 + $0x38] sm:$0xff]  ;;  %v188_v13 = vld [vmem:[#allocation2 + $0x40] sm:$0xff]  ;;  %v189_v14 = vld [vmem:[#allocation2 + $0x48] sm:$0xff]  ;;  %vm554_vm8 = vcmask 1047559  }
  0x17   :  { %723 = vmatpush3.bf16.msra.mxu0 %v720_v3  ;;  %v732_v12 = vpack.c.bf16 %v187_v11, %v186_v9  ;;  %v30_v15 = vld [vmem:[%s921_s0 + $0x8] sm:$0xff]  ;;  %v31_v16 = vld [vmem:[%s921_s0 + $0x10] sm:$0xff]  ;;  %v736_v17 = vpack.c.bf16 %v189_v14, %v188_v13  ;;  %v191_v19 = vld [vmem:[#allocation2 + $0x58] sm:$0xff] }
  0x18   :  { %725 = vmatprep.subr.bf16.mxu0 %v724_v6  ;;  %729 = vmatprep.subr.bf16.mxu1 %v728_v10  ;;  %v190_v18 = vld [vmem:[#allocation2 + $0x50] sm:$0xff]  ;;  %v32_v20 = vld [vmem:[%s921_s0 + $0x18] sm:$0xff]  ;;  %v33_v21 = vld [vmem:[%s921_s0 + $0x20] sm:$0xff] }
  0x19   :  { %731 = vmatpush3.bf16.msra.mxu1 %v728_v10  ;;  %v740_v22 = vpack.c.bf16 %v191_v19, %v190_v18  ;;  %v192_v23 = vld [vmem:[#allocation2 + $0x60] sm:$0xff]  ;;  %v193_v24 = vld [vmem:[#allocation2 + $0x68] sm:$0xff]  ;;  %v35_v26 = vld [vmem:[%s921_s0 + $0x30] sm:$0xff] }
  0x1a   :  { %733 = vmatprep.subr.bf16.mxu1 %v732_v12  ;;  %v34_v25 = vld [vmem:[%s921_s0 + $0x28] sm:$0xff]  ;;  %v744_v27 = vpack.c.bf16 %v193_v24, %v192_v23  ;;  %v36_v28 = vld [vmem:[%s921_s0 + $0x38] sm:$0xff]  ;;  %v194_v29 = vld [vmem:[#allocation2 + $0x70] sm:$0xff] }
  0x1b   :  { %727 = vmatpush3.bf16.msra.mxu0 %v724_v6  ;;  %v195_v30 = vld [vmem:[#allocation2 + $0x78] sm:$0xff]  ;;  %v339_v32 = vld [vmem:[#allocation2 + $0x80] sm:$0xff]  ;;  %v340_v33 = vld [vmem:[#allocation2 + $0x88] sm:$0xff] }
  0x1c   :  { %v748_v31 = vpack.c.bf16 %v195_v30, %v194_v29  ;;  %v341_v34 = vld [vmem:[#allocation2 + $0x90] sm:$0xff]  ;;  %v752_v35 = vpack.c.bf16 %v340_v33, %v339_v32  ;;  %v342_v36 = vld [vmem:[#allocation2 + $0x98] sm:$0xff]  ;;  %v573_v38 = vld [vmem:[%s923_s2] ss:$0 sm:$0xff] }
  0x1d   :  { %735 = vmatpush3.bf16.msra.mxu1 %v732_v12  ;;  %v756_v37 = vpack.c.bf16 %v342_v36, %v341_v34  ;;  %v582_v63 = vld [vmem:[%s923_s2 + $0x8] ss:$0 sm:$0xff]  ;;  %v591_v24 = vld [vmem:[%s923_s2 + $0x10] ss:$0 sm:$0xff] }
  0x1e   :  { %653 = vmatmul.mubr.msk.f32.vlgmr.msra.gmra.mrb[0].mxu0 %vm46_vm0, %v30_v15  ;;  %737 = vmatprep.subr.bf16.mxu1 %v736_v17 }
  0x1f   :  { %655 = vmatprep.mubr.msk.f32.mxu0 %vm46_vm0, %v31_v16  ;;  %753 = vmatprep.subr.bf16.mxu0 %v752_v35 }
  0x20   :  { %755 = vmatpush3.bf16.msra.mxu0 %v752_v35 }
  0x21   :  { %739 = vmatpush3.bf16.msra.mxu1 %v736_v17  ;;  %757 = vmatprep.subr.bf16.mxu0 %v756_v37 }
  0x22   :  { %656 = vmatmul.mubr.msk.f32.gmra.mrb[2].mxu0 %vm46_vm0, %v32_v20  ;;  %741 = vmatprep.subr.bf16.mxu1 %v740_v22 }
  0x23   :  { %658 = vmatprep.mubr.msk.f32.mxu0 %vm46_vm0, %v33_v21 }
  0x24   :  { %759 = vmatpush3.bf16.msra.mxu0 %v756_v37 }
  0x25   :  { %743 = vmatpush3.bf16.msra.mxu1 %v740_v22 }
  0x26   :  { %659 = vmatmul.mubr.msk.f32.gmra.mrb[4].mxu0 %vm46_vm0, %v34_v25  ;;  %745 = vmatprep.subr.bf16.mxu1 %v744_v27 }
  0x27   :  { %661 = vmatprep.mubr.msk.f32.mxu0 %vm46_vm0, %v35_v26  ;;  %v477_v26 = vld [vmem:[%s923_s2 + $0x18] sm:$0xff]  ;;  %s815_s2 = smov [#allocation5]  }
  0x28   :  { %s564_s21 = sshll.u32 %s815_s2, 4  ;;  %s565_s21 = int_to_ptr.vmem [resolvable:$true] %s564_s21 }
  0x29   :  { %747 = vmatpush3.bf16.msra.mxu1 %v744_v27  ;;  %s786_s22 = scalar_lea.vmem %s565_s21, 128  ;;  %p791_p9 = scmp.lt.s32.totalorder %s565_s21, %s565_s21 }
  0x2a   :  { %662 = vmatmul.mubr.msk.f32.gmra.mrb[6].mxu0 %vm46_vm0, %v36_v28  ;;  %749 = vmatprep.subr.bf16.mxu1 %v748_v31  ;;  %p787_p8 = scmp.ne.s32.totalorder %s565_s21, %s786_s22  ;;  %p792_p10 = scmp.lt.s32.totalorder %s786_s22, %s786_s22 }
  0x2c   :  { %p793_p11 = por %p792_p10, %p791_p9 }
  0x2d   :  { %751 = vmatpush3.bf16.msra.mxu1 %v748_v31 }
  0x2e   :  { %p794_p12 = pnand %p793_p11, %p787_p8 }
  0xf1   :  { %v654_v39 = vpop.f32.mrb[0].mxu0 }
  0xf2   :  { %v143_v40 = vadd.f32 %v654_v39, %v573_v38  ;;  %v137_v41 = vpop.f32.mrb[1].mxu0 }
  0xf3   :  { %v138_v42 = vadd.f32 %v573_v38, %v137_v41 }
  0xf4   :  { %v177_v45 = vmax.f32 %v143_v40, 0.0 }
  0xf5   :  { %v176_v43 = vmax.f32 %v138_v42, 0.0  ;;  %v657_v44 = vpop.f32.mrb[2].mxu0 }
  0xf6   :  { %v153_v46 = vadd.f32 %v657_v44, %v573_v38  ;;  %v147_v47 = vpop.f32.mrb[3].mxu0 }
  0xf7   :  { %v148_v48 = vadd.f32 %v573_v38, %v147_v47  ;;  %688 = vmatprep.mubr.msk.f32.mxu1 %vm201_vm1, %v176_v43 }
  0xf8   :  { %689 = vmatmul.mubr.msk.f32.vlgmr.msra.gmra.mrb[0].mxu1 %vm201_vm1, %v177_v45  ;;  %v179_v51 = vmax.f32 %v153_v46, 0.0 }
  0xf9   :  { %v178_v49 = vmax.f32 %v148_v48, 0.0  ;;  %v660_v50 = vpop.f32.mrb[4].mxu0 }
  0xfa   :  { %v163_v52 = vadd.f32 %v660_v50, %v573_v38  ;;  %v157_v53 = vpop.f32.mrb[5].mxu0 }
  0xfb   :  { %v158_v54 = vadd.f32 %v573_v38, %v157_v53  ;;  %691 = vmatprep.mubr.msk.f32.mxu1 %vm201_vm1, %v178_v49 }
  0xfc   :  { %692 = vmatmul.mubr.msk.f32.gmra.mrb[2].mxu1 %vm201_vm1, %v179_v51  ;;  %v181_v57 = vmax.f32 %v163_v52, 0.0 }
  0xfd   :  { %v180_v55 = vmax.f32 %v158_v54, 0.0  ;;  %v663_v56 = vpop.f32.mrb[6].mxu0 }
  0xfe   :  { %v173_v58 = vadd.f32 %v663_v56, %v573_v38  ;;  %v167_v59 = vpop.f32.mrb[7].mxu0 }
  0xff   :  { %v168_v60 = vadd.f32 %v573_v38, %v167_v59  ;;  %694 = vmatprep.mubr.msk.f32.mxu1 %vm201_vm1, %v180_v55 }
 0x100   :  { %695 = vmatmul.mubr.msk.f32.gmra.mrb[4].mxu1 %vm201_vm1, %v181_v57  ;;  %v183_v62 = vmax.f32 %v173_v58, 0.0 }
 0x101   :  { %v182_v61 = vmax.f32 %v168_v60, 0.0 }
 0x103   :  { %697 = vmatprep.mubr.msk.f32.mxu1 %vm201_vm1, %v182_v61 }
 0x104   :  { %698 = vmatmul.mubr.msk.f32.gmra.mrb[6].mxu1 %vm201_vm1, %v183_v62 }
 0x1cb   :  { %v690_v0 = vpop.f32.mrb[0].mxu1 }
 0x1cc   :  { %v298_v1 = vadd.f32 %v690_v0, %v582_v63  ;;  %v292_v2 = vpop.f32.mrb[1].mxu1 }
 0x1cd   :  { %v293_v3 = vadd.f32 %v582_v63, %v292_v2 }
 0x1ce   :  { %v332_v6 = vmax.f32 %v298_v1, 0.0 }
 0x1cf   :  { %v331_v4 = vmax.f32 %v293_v3, 0.0  ;;  %v693_v5 = vpop.f32.mrb[2].mxu1 }
 0x1d0   :  { %v308_v7 = vadd.f32 %v693_v5, %v582_v63  ;;  %v302_v8 = vpop.f32.mrb[3].mxu1 }
 0x1d1   :  { %v303_v9 = vadd.f32 %v582_v63, %v302_v8  ;;  %708 = vmatprep.mubr.msk.f32.mxu0 %vm46_vm0, %v331_v4 }
 0x1d2   :  { %709 = vmatmul.mubr.msk.f32.vlgmr.msra.gmra.mrb[8].mxu0 %vm46_vm0, %v332_v6  ;;  %v334_v12 = vmax.f32 %v308_v7, 0.0 }
 0x1d3   :  { %v333_v10 = vmax.f32 %v303_v9, 0.0  ;;  %v696_v11 = vpop.f32.mrb[4].mxu1 }
 0x1d4   :  { %v318_v13 = vadd.f32 %v696_v11, %v582_v63  ;;  %v312_v14 = vpop.f32.mrb[5].mxu1 }
 0x1d5   :  { %v313_v15 = vadd.f32 %v582_v63, %v312_v14  ;;  %711 = vmatprep.mubr.msk.f32.mxu0 %vm46_vm0, %v333_v10 }
 0x1d6   :  { %712 = vmatmul.mubr.msk.f32.gmra.mrb[10].mxu0 %vm46_vm0, %v334_v12  ;;  %v336_v18 = vmax.f32 %v318_v13, 0.0 }
 0x1d7   :  { %v335_v16 = vmax.f32 %v313_v15, 0.0  ;;  %v699_v17 = vpop.f32.mrb[6].mxu1 }
 0x1d8   :  { %v328_v19 = vadd.f32 %v699_v17, %v582_v63  ;;  %v322_v20 = vpop.f32.mrb[7].mxu1 }
 0x1d9   :  { %v323_v21 = vadd.f32 %v582_v63, %v322_v20  ;;  %714 = vmatprep.mubr.msk.f32.mxu0 %vm46_vm0, %v335_v16 }
 0x1da   :  { %715 = vmatmul.mubr.msk.f32.gmra.mrb[12].mxu0 %vm46_vm0, %v336_v18  ;;  %v338_v23 = vmax.f32 %v328_v19, 0.0 }
 0x1db   :  { %v337_v22 = vmax.f32 %v323_v21, 0.0 }
 0x1dd   :  { %717 = vmatprep.mubr.msk.f32.mxu0 %vm46_vm0, %v337_v22 }
 0x1de   :  { %718 = vmatmul.mubr.msk.f32.gmra.mrb[14].mxu0 %vm46_vm0, %v338_v23 }
 0x2a5   :  { %v710_v25 = vpop.f32.mrb[8].mxu0 }
 0x2a6   :  { %v444_v27 = vadd.f32 %v710_v25, %v591_v24  ;;  %v438_v28 = vpop.f32.mrb[9].mxu0 }
 0x2a7   :  { %v439_v29 = vadd.f32 %v591_v24, %v438_v28 }
 0x2a8   :  { %v479_v30 = vmul.f32 %v477_v26, %v444_v27 }
 0x2a9   :  { %v478_v31 = vmul.f32 %v477_v26, %v439_v29  ;;  %v713_v32 = vpop.f32.mrb[10].mxu0 }
 0x2aa   :  { %v492_v33 = vrot.slane %v479_v30, 4  ;;  %v454_v34 = vadd.f32 %v713_v32, %v591_v24  ;;  %v448_v35 = vpop.f32.mrb[11].mxu0 }
 0x2ab   :  { %v486_v36 = vrot.slane %v478_v31, 4  ;;  %v449_v37 = vadd.f32 %v591_v24, %v448_v35 }
 0x2ac   :  { %v493_v38 = vadd.f32 %v492_v33, %v479_v30  ;;  %v481_v39 = vmul.f32 %v477_v26, %v454_v34 }
 0x2ad   :  { %v487_v40 = vadd.f32 %v486_v36, %v478_v31  ;;  %v480_v41 = vmul.f32 %v477_v26, %v449_v37  ;;  %v716_v42 = vpop.f32.mrb[12].mxu0 }
 0x2ae   :  { %v494_v43 = vrot.slane %v493_v38, 2  ;;  %v504_v44 = vrot.slane %v481_v39, 4  ;;  %v464_v45 = vadd.f32 %v716_v42, %v591_v24  ;;  %v458_v46 = vpop.f32.mrb[13].mxu0 }
 0x2af   :  { %v488_v47 = vrot.slane %v487_v40, 2  ;;  %v498_v48 = vrot.slane %v480_v41, 4  ;;  %v459_v49 = vadd.f32 %v591_v24, %v458_v46 }
 0x2b0   :  { %v495_v50 = vadd.f32 %v494_v43, %v493_v38  ;;  %v505_v51 = vadd.f32 %v504_v44, %v481_v39  ;;  %v483_v52 = vmul.f32 %v477_v26, %v464_v45 }
 0x2b1   :  { %v489_v53 = vadd.f32 %v488_v47, %v487_v40  ;;  %v499_v54 = vadd.f32 %v498_v48, %v480_v41  ;;  %v482_v55 = vmul.f32 %v477_v26, %v459_v49  ;;  %v719_v56 = vpop.f32.mrb[14].mxu0 }
 0x2b2   :  { %v496_v57 = vrot.slane %v495_v50, 1  ;;  %v506_v58 = vrot.slane %v505_v51, 2  ;;  %v516_v59 = vrot.slane %v483_v52, 4  ;;  %v474_v60 = vadd.f32 %v719_v56, %v591_v24  ;;  %v468_v61 = vpop.f32.mrb[15].mxu0 }
 0x2b3   :  { %v490_v62 = vrot.slane %v489_v53, 1  ;;  %v500_v63 = vrot.slane %v499_v54, 2  ;;  %v510_v0 = vrot.slane %v482_v55, 4  ;;  %v469_v1 = vadd.f32 %v591_v24, %v468_v61 }
 0x2b4   :  { %v497_v2 = vadd.f32 %v496_v57, %v495_v50  ;;  %v507_v3 = vadd.f32 %v506_v58, %v505_v51  ;;  %v517_v4 = vadd.f32 %v516_v59, %v483_v52  ;;  %v485_v5 = vmul.f32 %v477_v26, %v474_v60 }
 0x2b5   :  { %v491_v6 = vadd.f32 %v490_v62, %v489_v53  ;;  %v501_v7 = vadd.f32 %v500_v63, %v499_v54  ;;  %v511_v8 = vadd.f32 %v510_v0, %v482_v55  ;;  %v484_v9 = vmul.f32 %v477_v26, %v469_v1 }
 0x2b6   :  { %v508_v10 = vrot.slane %v507_v3, 1  ;;  %v518_v11 = vrot.slane %v517_v4, 2  ;;  %v528_v12 = vrot.slane %v485_v5, 4 }
 0x2b7   :  { %v543_v13 = vsel %vm542_vm2, %v497_v2, %v491_v6  ;;  %v502_v14 = vrot.slane %v501_v7, 1  ;;  %v512_v15 = vrot.slane %v511_v8, 2  ;;  %v522_v16 = vrot.slane %v484_v9, 4 }
 0x2b8   :  { %v519_v17 = vadd.f32 %v518_v11, %v517_v4  ;;  %v529_v18 = vadd.f32 %v528_v12, %v485_v5  ;;  %v509_v22 = vadd.f32 %v508_v10, %v507_v3 }
 0x2b9   :  { %v503_v19 = vadd.f32 %v502_v14, %v501_v7  ;;  %v513_v20 = vadd.f32 %v512_v15, %v511_v8  ;;  %v523_v21 = vadd.f32 %v522_v16, %v484_v9 }
 0x2ba   :  { %v520_v23 = vrot.slane %v519_v17, 1  ;;  %v530_v24 = vrot.slane %v529_v18, 2 }
 0x2bb   :  { %v545_v25 = vsel %vm544_vm3, %v503_v19, %v543_v13  ;;  %v514_v26 = vrot.slane %v513_v20, 1  ;;  %v524_v27 = vrot.slane %v523_v21, 2 }
 0x2bc   :  { %v531_v28 = vadd.f32 %v530_v24, %v529_v18  ;;  %v547_v29 = vsel %vm546_vm4, %v509_v22, %v545_v25  ;;  %v521_v32 = vadd.f32 %v520_v23, %v519_v17 }
 0x2bd   :  { %v515_v30 = vadd.f32 %v514_v26, %v513_v20  ;;  %v525_v31 = vadd.f32 %v524_v27, %v523_v21 }
 0x2be   :  { %v532_v33 = vrot.slane %v531_v28, 1 }
 0x2bf   :  { %v526_v34 = vrot.slane %v525_v31, 1  ;;  %v549_v35 = vsel %vm548_vm5, %v515_v30, %v547_v29 }
 0x2c0   :  { %v551_v36 = vsel %vm550_vm6, %v521_v32, %v549_v35  ;;  %v533_v38 = vadd.f32 %v532_v33, %v531_v28 }
 0x2c1   :  { %v527_v37 = vadd.f32 %v526_v34, %v525_v31 }
 0x2c3   :  { %v553_v39 = vsel %vm552_vm7, %v527_v37, %v551_v36 }
 0x2c4   :  { %v555_v40 = vsel %vm554_vm8, %v533_v38, %v553_v39 }
 0x2c5   :  { %557 = vst [vmem:[#allocation5] sm:$0xff] %v555_v40 }
 0x2c6   :  { %797 = shalt.err (!%p794_p12)
}
 0x2c7   :  { %s798_s25 = scalar_lea.hbm %s924_s3, 128 }
 0x2c8   :  { %p799_p13 = scmp.ne.s32.totalorder %s924_s3, %s798_s25  ;;  %p802_p0 = scmp.lt.u32.totalorder %s798_s25, %s924_s3 }
 0x2ca   :  { %p804_p1 = pnand %p802_p0, %p799_p13 }
 0x2cc   :  { %807 = shalt.err (!%p804_p1)
}
 0x2cd   :  { %567 = dma.vmem_to_hbm [thread:$0]  %s565_s21, 128, %s924_s3, [#allocation4]  }
 0x2ce   :  { %810 = dma.done.wait [#allocation4], 128  }
 0x2cf   :  { %811 = vsyncadd [#allocation4], 4294967168 }
 0x2d0   :  { %571 = vsyncpa [#allocation3], 1 }
 0x2d1   :  { %572 = vsyncpa [#allocation4], 1 }

</bundles_post_ra>
